<compile_context>
chip_gen: v5e
topology: v5e:2x2
jax: 0.10.0
libtpu: 0.0.40
codegen_flags: <defaults>
</compile_context>

<pallas_src>
import jax
import jax.numpy as jnp
from jax.experimental import pallas as pl
from jax.experimental.pallas import tpu as pltpu


def _round_up(x, m):
    return ((x + m - 1) // m) * m


def _make_act_kernel(a_valid, mask_mode):
    """Build the kernel; `a_valid` (real action_dim) is a static Python int."""

    def kernel(x_ref, w_ref, b_ref, *rest):
        if mask_mode == "none":
            (logp_ref,) = rest
            mask_ref = None
        else:
            mask_ref, logp_ref = rest

        # (TB, D) @ (D, A_pad) on the MXU, f32 accumulation, then bias.
        logits = jnp.dot(x_ref[...], w_ref[...],
                         preferred_element_type=jnp.float32) + b_ref[...]

        # Mask (a) lane padding beyond the real action_dim and
        # (b) unavailable actions — exactly the PyTorch -1e10 masking.
        col = jax.lax.broadcasted_iota(jnp.int32, logits.shape, 1)
        valid = col < a_valid
        if mask_mode == "bitmask":
            # mask_ref: (TB, 1) int32, bit k set => action k available.
            bits = jnp.right_shift(mask_ref[...], jnp.minimum(col, 31)) & 1
            valid = jnp.logical_and(valid, bits != 0)
        elif mask_mode == "dense":
            valid = jnp.logical_and(valid, mask_ref[...] != 0)
        masked = jnp.where(valid, logits, -1e10)

        # Stable log-softmax in f32 (VPU/EUP f32 path; safe on v5e too).
        m = jnp.max(masked, axis=-1, keepdims=True)
        e = jnp.exp(masked - m)
        s = jnp.sum(e, axis=-1, keepdims=True)
        logp_ref[...] = (masked - (m + jnp.log(s))).astype(logp_ref.dtype)

    return kernel


def make_categorical_head_params(w, b):
    """One-time cast + lane-pad of the Categorical head parameters.

    Call once (e.g. at init / after each optimizer step), reuse across forward
    calls so the per-step path does no parameter conversion work.
    """
    D, A = w.shape
    A_pad = _round_up(A, 128)
    w_p = jnp.zeros((D, A_pad), jnp.bfloat16).at[:, :A].set(w.astype(jnp.bfloat16))
    b_p = jnp.zeros((1, A_pad), jnp.float32).at[:, :A].set(
        jnp.asarray(b, jnp.float32).reshape(1, A))
    return {"w": w_p, "b": b_p, "action_dim": A}


def act_layer_forward(x, params, available_actions=None, *,
                      tile_b=2048, out_dtype=jnp.float32):
    """Categorical action-head forward. Returns log_probs of shape (B, A)."""
    w_p, b_p, A = params["w"], params["b"], params["action_dim"]
    B, D = x.shape
    A_pad = w_p.shape[1]

    # Batch handling: pad only to a multiple of 8 sublanes (<= 7 extra rows),
    # then let the grid be ragged over it — no full-tile zero+scatter pass.
    B8 = _round_up(B, 8)
    TB = min(_round_up(tile_b, 32), B8)
    if B8 >= 64:
        # Keep >= 2 (balanced) grid steps so both v7x TensorCores get work.
        TB = min(TB, _round_up(pl.cdiv(B8, 2), 32))
    TB = max(TB, 8)

    x_in = x.astype(jnp.bfloat16)          # bf16 operands, f32 MXU accumulation
    if B8 != B:
        x_in = jnp.pad(x_in, ((0, B8 - B), (0, 0)))

    in_specs = [
        pl.BlockSpec((TB, D), lambda i: (i, 0)),      # x: batch-tiled
        pl.BlockSpec((D, A_pad), lambda i: (0, 0)),   # W: resident across steps
        pl.BlockSpec((1, A_pad), lambda i: (0, 0)),   # bias: resident
    ]
    operands = [x_in, w_p, b_p]

    if available_actions is None:
        mask_mode = "none"
        mask_row_bytes = 0
    elif A <= 32:
        # Pack the availability row into one int32 bitmask: 4 B/row of DMA.
        mask_mode = "bitmask"
        mask_row_bytes = 4
        weights = jnp.left_shift(jnp.int32(1),
                                 jnp.arange(A, dtype=jnp.int32))[None, :]
        mask32 = jnp.sum((available_actions != 0).astype(jnp.int32) * weights,
                         axis=-1, keepdims=True).astype(jnp.int32)
        if B8 != B:
            mask32 = jnp.pad(mask32, ((0, B8 - B), (0, 0)))
        in_specs.append(pl.BlockSpec((TB, 1), lambda i: (i, 0)))
        operands.append(mask32)
    else:
        # Fallback for wide action spaces: lane-padded int8 mask.
        mask_mode = "dense"
        mask_row_bytes = A_pad
        avail_p = jnp.zeros((B8, A_pad), jnp.int8).at[:B, :A].set(
            (available_actions != 0).astype(jnp.int8))
        in_specs.append(pl.BlockSpec((TB, A_pad), lambda i: (i, 0)))
        operands.append(avail_p)

    kernel = _make_act_kernel(A, mask_mode)

    # Explicit VMEM budget: resident W/b + double-buffered x / mask / out tiles.
    out_itemsize = jnp.dtype(out_dtype).itemsize
    need = (D * A_pad * 2 + A_pad * 4) \
        + 2 * TB * (D * 2 + mask_row_bytes + A_pad * out_itemsize)
    vmem_limit = int(min(max(4 * need, 16 << 20), 32 << 20))

    logp = pl.pallas_call(
        kernel,
        out_shape=jax.ShapeDtypeStruct((B8, A_pad), out_dtype),
        grid=(pl.cdiv(B8, TB),),
        in_specs=in_specs,
        out_specs=pl.BlockSpec((TB, A_pad), lambda i: (i, 0)),
        compiler_params=pltpu.CompilerParams(
            dimension_semantics=("parallel",),   # batch axis: megacore-shardable
            vmem_limit_bytes=vmem_limit,
        ),
    )(*operands)

    # Note: a row with zero available actions yields a uniform -log(A_pad)
    # instead of PyTorch's -log(A); callers must guarantee >=1 available action.
    return logp[:B, :A]


def orthogonal_init(key, shape, gain=0.01, dtype=jnp.float32):
    """Deterministic orthogonal init (matches nn.init.orthogonal_ semantics)."""
    rows, cols = shape
    n = max(rows, cols)
    a = jax.random.normal(key, (n, n), dtype=jnp.float32)
    q, r = jnp.linalg.qr(a)
    q = q * jnp.sign(jnp.diag(r))[None, :]
    return (gain * q[:rows, :cols]).astype(dtype)


if __name__ == "__main__":
    key = jax.random.PRNGKey(0)
    k_x, k_w, k_a = jax.random.split(key, 3)

    batch = 8          # number of agents / env steps
    inputs_dim = 32    # hidden size feeding the action head
    action_dim = 16    # Discrete(16) action space

    x = jax.random.normal(k_x, (batch, inputs_dim), dtype=jnp.float32)

    # Categorical head params (orthogonal weight with gain, zero bias),
    # converted/padded once and reused across forward calls.
    gain = 0.01
    w = orthogonal_init(k_w, (inputs_dim, action_dim), gain=gain)
    b = jnp.zeros((action_dim,), dtype=jnp.float32)
    params = make_categorical_head_params(w, b)

    # available_actions mask (at least one action available per row).
    avail = (jax.random.uniform(k_a, (batch, action_dim)) > 0.3).astype(jnp.float32)
    avail = avail.at[:, 0].set(1.0)

    log_probs = act_layer_forward(x, params, avail)                 # masked branch
    log_probs_none = act_layer_forward(x, params, None)             # no-mask branch
    log_probs_bf16 = act_layer_forward(x, params, avail,
                                       out_dtype=jnp.bfloat16)      # bf16 output
    jax.block_until_ready((log_probs, log_probs_none, log_probs_bf16))

    # Reference in plain JAX (same bf16 operands, f32 accumulation).
    ref_logits = jnp.dot(x.astype(jnp.bfloat16), w.astype(jnp.bfloat16),
                         preferred_element_type=jnp.float32) + b
    ref_masked = jnp.where(avail > 0, ref_logits, -1e10)
    ref_logp = ref_masked - jax.nn.logsumexp(ref_masked, axis=-1, keepdims=True)
    ref_logp_none = ref_logits - jax.nn.logsumexp(ref_logits, axis=-1, keepdims=True)

    assert log_probs.shape == (batch, action_dim)
    assert jnp.allclose(log_probs, ref_logp, atol=2e-3, rtol=2e-3)
    assert jnp.allclose(log_probs_none, ref_logp_none, atol=2e-3, rtol=2e-3)
    assert jnp.allclose(log_probs_bf16.astype(jnp.float32), ref_logp,
                        atol=5e-2, rtol=2e-2)

    # TODO(synk): sampling / entropy / reduce closures and the MultiDiscrete /
    # Box / MultiBinary / mixed action-space branches are host-side
    # distribution plumbing, not kernel compute; only the Categorical
    # (Discrete) head hot path is in-kernel.
    print("KERNEL_OK")
</pallas_src>

<mosaic_0001>
module attributes {stable_mosaic.version = 11 : i64} {
  func.func @kernel(%arg0: i32, %arg1: memref<8x32xbf16, #tpu.memory_space<vmem>>, %arg2: memref<32x128xbf16, #tpu.memory_space<vmem>>, %arg3: memref<1x128xf32, #tpu.memory_space<vmem>>, %arg4: memref<8x1xi32, #tpu.memory_space<vmem>>, %arg5: memref<8x128xf32, #tpu.memory_space<vmem>>) attributes {dimension_semantics = [#tpu.dimension_semantics<parallel>], iteration_bounds = array<i64: 1>, scalar_prefetch = 0 : i64, scratch_operands = 0 : i64, tpu.core_type = #tpu.core_type<tc>, window_params = [{transform_indices = @transform_0, window_bounds = array<i64: 8, 32>}, {pipeline_mode = #tpu.pipeline_mode<synchronous>, transform_indices = @transform_1, window_bounds = array<i64: 32, 128>}, {pipeline_mode = #tpu.pipeline_mode<synchronous>, transform_indices = @transform_2, window_bounds = array<i64: 1, 128>}, {transform_indices = @transform_3, window_bounds = array<i64: 8, 1>}, {transform_indices = @transform_4, window_bounds = array<i64: 8, 128>}]} {
    %c0 = arith.constant 0 : index
    %c0_0 = arith.constant 0 : index
    %0 = vector.load %arg1[%c0, %c0_0] : memref<8x32xbf16, #tpu.memory_space<vmem>>, vector<8x32xbf16>
    %c0_1 = arith.constant 0 : index
    %c0_2 = arith.constant 0 : index
    %1 = vector.load %arg2[%c0_1, %c0_2] : memref<32x128xbf16, #tpu.memory_space<vmem>>, vector<32x128xbf16>
    %cst = arith.constant dense<0.000000e+00> : vector<8x128xf32>
    %2 = tpu.matmul %0, %1, %cst {dimension_numbers = #tpu.dot_dimension_numbers<[1], [0], [0], [1], [0, 0, 1, 1], [], []>} : vector<8x32xbf16>, vector<32x128xbf16>, vector<8x128xf32> -> vector<8x128xf32>
    %c0_3 = arith.constant 0 : index
    %c0_4 = arith.constant 0 : index
    %3 = vector.load %arg3[%c0_3, %c0_4] : memref<1x128xf32, #tpu.memory_space<vmem>>, vector<1x128xf32>
    %4 = vector.broadcast %3 : vector<1x128xf32> to vector<8x128xf32>
    %5 = arith.addf %2, %4 : vector<8x128xf32>
    %6 = tpu.iota {dimensions = array<i32: 1>} : vector<8x128xi32>
    %c16_i32 = arith.constant 16 : i32
    %7 = vector.broadcast %c16_i32 : i32 to vector<8x128xi32>
    %8 = arith.cmpi slt, %6, %7 : vector<8x128xi32>
    %c0_5 = arith.constant 0 : index
    %c0_6 = arith.constant 0 : index
    %9 = vector.load %arg4[%c0_5, %c0_6] : memref<8x1xi32, #tpu.memory_space<vmem>>, vector<8x1xi32>
    %c31_i32 = arith.constant 31 : i32
    %10 = vector.broadcast %c31_i32 : i32 to vector<8x128xi32>
    %11 = arith.minsi %6, %10 : vector<8x128xi32>
    %12 = vector.broadcast %9 : vector<8x1xi32> to vector<8x128xi32>
    %13 = arith.shrsi %12, %11 : vector<8x128xi32>
    %c1_i32 = arith.constant 1 : i32
    %14 = vector.broadcast %c1_i32 : i32 to vector<8x128xi32>
    %15 = arith.andi %13, %14 : vector<8x128xi32>
    %c0_i32 = arith.constant 0 : i32
    %16 = vector.broadcast %c0_i32 : i32 to vector<8x128xi32>
    %17 = arith.cmpi ne, %15, %16 : vector<8x128xi32>
    %18 = arith.andi %8, %17 : vector<8x128xi1>
    %cst_7 = arith.constant -1.000000e+10 : f32
    %19 = vector.broadcast %cst_7 : f32 to vector<8x128xf32>
    %20 = arith.select %18, %5, %19 : vector<8x128xi1>, vector<8x128xf32>
    %cst_8 = arith.constant dense<0xFF800000> : vector<8xf32>
    %21 = vector.multi_reduction <maximumf>, %20, %cst_8 [1] : vector<8x128xf32> to vector<8xf32>
    %22 = vector.shape_cast %21 : vector<8xf32> to vector<8x1xf32>
    %23 = vector.broadcast %22 : vector<8x1xf32> to vector<8x128xf32>
    %24 = arith.subf %20, %23 : vector<8x128xf32>
    %25 = math.exp %24 : vector<8x128xf32>
    %cst_9 = arith.constant dense<0.000000e+00> : vector<8xf32>
    %26 = vector.multi_reduction <add>, %25, %cst_9 [1] : vector<8x128xf32> to vector<8xf32>
    %27 = vector.shape_cast %26 : vector<8xf32> to vector<8x1xf32>
    %28 = math.log %27 : vector<8x1xf32>
    %29 = arith.addf %22, %28 : vector<8x1xf32>
    %30 = vector.broadcast %29 : vector<8x1xf32> to vector<8x128xf32>
    %31 = arith.subf %20, %30 : vector<8x128xf32>
    %c0_10 = arith.constant 0 : index
    %c0_11 = arith.constant 0 : index
    %32 = vector.load %arg5[%c0_10, %c0_11] : memref<8x128xf32, #tpu.memory_space<vmem>>, vector<8x128xf32>
    tpu.vector_store %arg5[%c0_10, %c0_11], %31 {strides = array<i32>} : memref<8x128xf32, #tpu.memory_space<vmem>>, vector<8x128xf32>,
    return
  }
  func.func @transform_0(%arg0: i32) -> (i32, i32) {
    %c0_i32 = arith.constant 0 : i32
    %c0_i32_0 = arith.constant 0 : i32
    return %arg0, %c0_i32 : i32, i32
  }
  func.func @transform_1(%arg0: i32) -> (i32, i32) {
    %c0_i32 = arith.constant 0 : i32
    %c0_i32_0 = arith.constant 0 : i32
    %c0_i32_1 = arith.constant 0 : i32
    return %c0_i32, %c0_i32_0 : i32, i32
  }
  func.func @transform_2(%arg0: i32) -> (i32, i32) {
    %c0_i32 = arith.constant 0 : i32
    %c0_i32_0 = arith.constant 0 : i32
    %c0_i32_1 = arith.constant 0 : i32
    return %c0_i32, %c0_i32_0 : i32, i32
  }
  func.func @transform_3(%arg0: i32) -> (i32, i32) {
    %c0_i32 = arith.constant 0 : i32
    %c0_i32_0 = arith.constant 0 : i32
    return %arg0, %c0_i32 : i32, i32
  }
  func.func @transform_4(%arg0: i32) -> (i32, i32) {
    %c0_i32 = arith.constant 0 : i32
    %c0_i32_0 = arith.constant 0 : i32
    return %arg0, %c0_i32 : i32, i32
  }
}

</mosaic_0001>

<bundles_post_ra>
// kernel: tpu_custom_call.1
= control target key start
LH: loop header
LB: loop body
LE: loop exit
PB: predicated region body
PF: predicated region fallthrough
CT: control target
= control target key end

     0   :  { %9 = vsyncpa [#allocation3], 0  ;;  %s235_s0 = inlined_call_operand.vmem [shape: bf16[8,32], index: 0, kind: input, shape index: {}]   ;;  %s236_s1 = inlined_call_operand.hbm [shape: bf16[32,128], index: 1, kind: input, shape index: {}]   ;;  %s237_s2 = inlined_call_operand.vmem [shape: f32[1,128], index: 2, kind: input, shape index: {}]   ;;  %s238_s3 = inlined_call_operand.vmem [shape: s32[8,1], index: 3, kind: input, shape index: {}]   ;;  %s239_s4 = inlined_call_operand.hbm [shape: f32[8,128], index: 4, kind: output, shape index: {}]  }
   0x1   :  { %10 = vsyncpa [#allocation4], 0  ;;  %s17_s17 = sshll.u32 %s236_s1, 4  ;;  %s190_s18 = smov [#allocation2]   ;;  %s18_s17 = int_to_ptr.hbm [resolvable:$true] %s17_s17 }
   0x2   :  { %s19_s19 = sshll.u32 %s190_s18, 4  ;;  %s191_s20 = smov 64   ;;  %s20_s19 = int_to_ptr.vmem [resolvable:$true] %s19_s19 }
   0x3   :  { %s192_s21 = smov 4  }
   0x4   :  { %25 = dma.hbm_to_vmem [thread:$0]  %s18_s17, 256, %s20_s19, [#allocation3], %s191_s20, %s191_s20, %s192_s21  }
   0x5   :  { %186 = dma.done.wait [#allocation3], 256  }
   0x6   :  { %187 = vsyncadd [#allocation3], 4294967040  ;;  %v193_v0 = vmov 0   ;;  %v126_v1 = vld [vmem:[#allocation2 + $0x8] sm:$0xff]  ;;  %v76_v2 = vld [vmem:[%s238_s3] sm:$0xff]  ;;  %vm56_vm0 = vcmask 261120   ;;  %v73_v5 = vlaneseq }
   0x7   :  { %132 = vset.pattern.permute.xlu0 %v193_v0  ;;  %66 = vmatpush.bf16.msra.mxu0 %v126_v1  ;;  %v125_v3 = vld [vmem:[#allocation2] sm:$0xff]  ;;  %s106_s28 = sshll.u32 %s239_s4, 4  ;;  %s107_s28 = int_to_ptr.hbm [resolvable:$true] %s106_s28 }
   0x8   :  { %80 = vperm.xlu0 %132, %v76_v2   ;;  %v35_v4 = vld [vmem:[%s235_s0] sm:$0xf]  ;;  %v74_v6 = vand.u32 127, %v73_v5  ;;  %s194_s0 = smov [#allocation5]  }
   0x9   :  { %v133_v11 = vld [vmem:[%s237_s2] ss:$0 sm:$0xff]  ;;  %s104_s26 = sshll.u32 %s194_s0, 4  ;;  %s105_s26 = int_to_ptr.vmem [resolvable:$true] %s104_s26 }
   0xa   :  { %vm77_vm1 = vcmp.lt.s32.totalorder %v74_v6, 31  ;;  %vm75_vm2 = vcmp.lt.s32.totalorder %v74_v6, 16 }
   0xb   :  { %67 = vmatpush.bf16.msra.mxu0 %v125_v3  ;;  %v78_v7 = vsel %vm77_vm1, %v74_v6, 31 }
   0xe   :  { %124 = vmatmul.msk.bf16.vlgmr.msra.gmra.mxu0 %vm56_vm0, %v35_v4 }
  0x7a   :  { %v81_v8 = vpop.permute.xlu0 %80 }
  0x7b   :  { %v82_v9 = vshra.s32 %v81_v8, %v78_v7 }
  0x7d   :  { %v83_v10 = vand.u32 1, %v82_v9 }
  0x7f   :  { %vm84_vm3 = vcmp.ne.s32.totalorder %v83_v10, 0 }
  0x80   :  { %vm85_vm4 = vmand %vm75_vm2, %vm84_vm3 }
  0x8b   :  { %v69_v12 = vpop.f32.mrf.mxu0 }
  0x8c   :  { %v70_v13 = vadd.f32 %v133_v11, %v69_v12 }
  0x8e   :  { %v86_v14 = vsel %vm85_vm4, %v70_v13, -1e+10 }
  0x8f   :  { %87 = vmax.xlane.f32.xlu0 %v86_v14 }
  0x93   :  { %v71_v15 = vpop.f32.mrf.mxu0 }
 0x102   :  { %v88_v16 = vpop.xlane.xlu0 %87 }
 0x103   :  { %v89_v17 = vsub.f32 %v86_v14, %v88_v16 }
 0x105   :  { %v90_v18 = vmul.f32 1.442695, %v89_v17 }
 0x107   :  { %134 = vpow2.f32 %v90_v18 }
 0x10d   :  { %v135_v19 = vpop.eup %134 }
 0x10e   :  { %92 = vadd.xlane.f32.xlu1 %v135_v19 }
 0x181   :  { %v93_v20 = vpop.xlane.xlu1 %92 }
 0x182   :  { %136 = vlog2.f32 %v93_v20 }
 0x188   :  { %v137_v21 = vpop.eup %136 }
 0x189   :  { %v95_v22 = vmul.f32 0.6931472, %v137_v21 }
 0x18b   :  { %v96_v23 = vadd.f32 %v95_v22, %v88_v16 }
 0x18d   :  { %v97_v24 = vsub.f32 %v86_v14, %v96_v23 }
 0x18f   :  { %98 = vst [vmem:[#allocation5] sm:$0xff] %v97_v24 }
 0x190   :  { %109 = dma.vmem_to_hbm [thread:$0]  %s105_s26, 128, %s107_s28, [#allocation4]  }
 0x191   :  { %188 = dma.done.wait [#allocation4], 128  }
 0x192   :  { %189 = vsyncadd [#allocation4], 4294967168 }
 0x193   :  { %114 = vsyncpa [#allocation3], 1 }
 0x194   :  { %115 = vsyncpa [#allocation4], 1 }

</bundles_post_ra>
